<compile_context>
chip_gen: v7x
topology: tpu7x:2x2x1
jax: 0.10.0
libtpu: 0.0.40
codegen_flags: <defaults>
</compile_context>

<pallas_src>
import functools

import jax
import jax.numpy as jnp
from jax.experimental import pallas as pl
from jax.experimental.pallas import tpu as pltpu


def rnn_kernel(x_ref, w_ih_ref, w_hh_ref, b_ref, w_out_ref, b_out_ref, out_ref,
               *, seq_len, batch):
    """Vanilla RNN forward.

    x_ref holds the time-major, batch-padded, flattened input (T*B_pad, I).
    Hidden state is carried in vregs through a fully unrolled T-step loop.
    """
    H = w_hh_ref.shape[0]

    # Hoist every loop-invariant load once.
    w_hh = w_hh_ref[...]                                        # (H, H)
    b = jnp.broadcast_to(b_ref[...], (seq_len * batch, H))      # bias for all steps

    # ONE batched MXU call for all input projections (+ bias): (T*B, I) @ (I, H).
    # Independent of the recurrence, so it sits off the serial critical path.
    xw = jnp.dot(x_ref[...], w_ih_ref[...],
                 preferred_element_type=jnp.float32) + b        # (T*B, H)

    # Serial recurrence: one small MXU dot + add + tanh per step. Each step's
    # projection is a contiguous, sublane-aligned leading-dim row slab of xw.
    h = jnp.zeros((batch, H), jnp.float32)
    for t in range(seq_len):
        xw_t = xw[t * batch:(t + 1) * batch, :]                 # static, aligned slab
        h = jnp.tanh(xw_t + jnp.dot(h, w_hh,
                                    preferred_element_type=jnp.float32))

    # Linear head on the final hidden state.
    out_ref[...] = (
        jnp.dot(h, w_out_ref[...], preferred_element_type=jnp.float32)
        + b_out_ref[...]
    )


def rnn_forward(x, w_ih, w_hh, b, w_out, b_out):
    """x: (B, T, I) batch-first (PyTorch convention). Returns (B, O)."""
    B, T, I = x.shape
    O = w_out.shape[1]

    # Pad batch to the f32 sublane count so every (B, H) vreg is fully packed.
    SUBLANES = 8
    B_pad = ((B + SUBLANES - 1) // SUBLANES) * SUBLANES
    B_pad = max(B_pad, SUBLANES)

    # Time-major + zero-pad batch + collapse (T, B_pad) -> (T*B_pad,) so the
    # kernel does one batched input projection and per-step slices are
    # contiguous leading-dim slabs. Cheap one-shot XLA ops at this size.
    x_tm = jnp.transpose(x, (1, 0, 2))                       # (T, B, I)
    x_tm = jnp.pad(x_tm, ((0, 0), (0, B_pad - B), (0, 0)))   # (T, B_pad, I)
    x_flat = x_tm.reshape(T * B_pad, I)                      # (T*B_pad, I)

    out_padded = pl.pallas_call(
        functools.partial(rnn_kernel, seq_len=T, batch=B_pad),
        out_shape=jax.ShapeDtypeStruct((B_pad, O), jnp.float32),
        in_specs=[
            pl.BlockSpec(memory_space=pltpu.MemorySpace.VMEM),  # x (T*B_pad, I)
            pl.BlockSpec(memory_space=pltpu.MemorySpace.VMEM),  # W_ih (I, H)
            pl.BlockSpec(memory_space=pltpu.MemorySpace.VMEM),  # W_hh (H, H)
            pl.BlockSpec(memory_space=pltpu.MemorySpace.VMEM),  # b (1, H)
            pl.BlockSpec(memory_space=pltpu.MemorySpace.VMEM),  # W_out (H, O)
            pl.BlockSpec(memory_space=pltpu.MemorySpace.VMEM),  # b_out (1, O)
        ],
        out_specs=pl.BlockSpec(memory_space=pltpu.MemorySpace.VMEM),
    )(x_flat, w_ih, w_hh, b, w_out, b_out)

    # Padded rows are mathematically harmless but must not be returned.
    return out_padded[:B]


def rnn_forward_ref(x, w_ih, w_hh, b, w_out, b_out):
    """Pure-JAX reference for correctness checking."""
    B, T, I = x.shape
    H = w_hh.shape[0]
    h = jnp.zeros((B, H), jnp.float32)
    for t in range(T):
        h = jnp.tanh(x[:, t, :] @ w_ih + h @ w_hh + b)
    return h @ w_out + b_out


if __name__ == "__main__":
    # Hyperparameters (RNNHyperparameters): small, kernel-friendly shapes.
    batch_size = 4
    sequence_length = 8
    input_size = 8
    hidden_size = 32
    output_size = 8   # output_size defaults to input_size in RNNHyperparameters

    key = jax.random.PRNGKey(0)
    kx, k1, k2, k3, k4, k5 = jax.random.split(key, 6)

    x = jax.random.normal(kx, (batch_size, sequence_length, input_size),
                          dtype=jnp.float32)

    scale = 1.0 / jnp.sqrt(hidden_size)
    w_ih = scale * jax.random.normal(k1, (input_size, hidden_size), jnp.float32)
    w_hh = scale * jax.random.normal(k2, (hidden_size, hidden_size), jnp.float32)
    b = scale * jax.random.normal(k3, (1, hidden_size), jnp.float32)
    w_out = scale * jax.random.normal(k4, (hidden_size, output_size), jnp.float32)
    b_out = scale * jax.random.normal(k5, (1, output_size), jnp.float32)

    out = rnn_forward(x, w_ih, w_hh, b, w_out, b_out)
    out = jax.block_until_ready(out)

    ref = rnn_forward_ref(x, w_ih, w_hh, b, w_out, b_out)
    assert out.shape == (batch_size, output_size)
    assert jnp.allclose(out, ref, atol=1e-4, rtol=1e-4), "mismatch vs reference"

    print("KERNEL_OK")
</pallas_src>

<mosaic_0001>
module attributes {stable_mosaic.version = 11 : i64} {
  func.func @rnn_kernel(%arg0: memref<64x8xf32, #tpu.memory_space<vmem>>, %arg1: memref<8x32xf32, #tpu.memory_space<vmem>>, %arg2: memref<32x32xf32, #tpu.memory_space<vmem>>, %arg3: memref<1x32xf32, #tpu.memory_space<vmem>>, %arg4: memref<32x8xf32, #tpu.memory_space<vmem>>, %arg5: memref<1x8xf32, #tpu.memory_space<vmem>>, %arg6: memref<8x8xf32, #tpu.memory_space<vmem>>) attributes {dimension_semantics = [], scalar_prefetch = 0 : i64, scratch_operands = 0 : i64, tpu.core_type = #tpu.core_type<tc>} {
    %c0 = arith.constant 0 : index
    %c0_0 = arith.constant 0 : index
    %0 = vector.load %arg2[%c0, %c0_0] : memref<32x32xf32, #tpu.memory_space<vmem>>, vector<32x32xf32>
    %c0_1 = arith.constant 0 : index
    %c0_2 = arith.constant 0 : index
    %1 = vector.load %arg3[%c0_1, %c0_2] : memref<1x32xf32, #tpu.memory_space<vmem>>, vector<1x32xf32>
    %2 = vector.shape_cast %1 : vector<1x32xf32> to vector<1x32xf32>
    %3 = vector.broadcast %2 : vector<1x32xf32> to vector<64x32xf32>
    %c0_3 = arith.constant 0 : index
    %c0_4 = arith.constant 0 : index
    %4 = vector.load %arg0[%c0_3, %c0_4] : memref<64x8xf32, #tpu.memory_space<vmem>>, vector<64x8xf32>
    %c0_5 = arith.constant 0 : index
    %c0_6 = arith.constant 0 : index
    %5 = vector.load %arg1[%c0_5, %c0_6] : memref<8x32xf32, #tpu.memory_space<vmem>>, vector<8x32xf32>
    %cst = arith.constant dense<0.000000e+00> : vector<64x32xf32>
    %6 = tpu.matmul %4, %5, %cst {dimension_numbers = #tpu.dot_dimension_numbers<[1], [0], [0], [1], [0, 0, 1, 1], [], []>} : vector<64x8xf32>, vector<8x32xf32>, vector<64x32xf32> -> vector<64x32xf32>
    %7 = arith.addf %6, %3 : vector<64x32xf32>
    %cst_7 = arith.constant 0.000000e+00 : f32
    %8 = vector.broadcast %cst_7 : f32 to vector<8x32xf32>
    %9 = vector.extract_strided_slice %7 {offsets = [0, 0], sizes = [8, 32], strides = [1, 1]} : vector<64x32xf32> to vector<8x32xf32>
    %cst_8 = arith.constant dense<0.000000e+00> : vector<8x32xf32>
    %10 = tpu.matmul %8, %0, %cst_8 {dimension_numbers = #tpu.dot_dimension_numbers<[1], [0], [0], [1], [0, 0, 1, 1], [], []>} : vector<8x32xf32>, vector<32x32xf32>, vector<8x32xf32> -> vector<8x32xf32>
    %11 = arith.addf %9, %10 : vector<8x32xf32>
    %12 = math.tanh %11 : vector<8x32xf32>
    %13 = vector.extract_strided_slice %7 {offsets = [8, 0], sizes = [8, 32], strides = [1, 1]} : vector<64x32xf32> to vector<8x32xf32>
    %cst_9 = arith.constant dense<0.000000e+00> : vector<8x32xf32>
    %14 = tpu.matmul %12, %0, %cst_9 {dimension_numbers = #tpu.dot_dimension_numbers<[1], [0], [0], [1], [0, 0, 1, 1], [], []>} : vector<8x32xf32>, vector<32x32xf32>, vector<8x32xf32> -> vector<8x32xf32>
    %15 = arith.addf %13, %14 : vector<8x32xf32>
    %16 = math.tanh %15 : vector<8x32xf32>
    %17 = vector.extract_strided_slice %7 {offsets = [16, 0], sizes = [8, 32], strides = [1, 1]} : vector<64x32xf32> to vector<8x32xf32>
    %cst_10 = arith.constant dense<0.000000e+00> : vector<8x32xf32>
    %18 = tpu.matmul %16, %0, %cst_10 {dimension_numbers = #tpu.dot_dimension_numbers<[1], [0], [0], [1], [0, 0, 1, 1], [], []>} : vector<8x32xf32>, vector<32x32xf32>, vector<8x32xf32> -> vector<8x32xf32>
    %19 = arith.addf %17, %18 : vector<8x32xf32>
    %20 = math.tanh %19 : vector<8x32xf32>
    %21 = vector.extract_strided_slice %7 {offsets = [24, 0], sizes = [8, 32], strides = [1, 1]} : vector<64x32xf32> to vector<8x32xf32>
    %cst_11 = arith.constant dense<0.000000e+00> : vector<8x32xf32>
    %22 = tpu.matmul %20, %0, %cst_11 {dimension_numbers = #tpu.dot_dimension_numbers<[1], [0], [0], [1], [0, 0, 1, 1], [], []>} : vector<8x32xf32>, vector<32x32xf32>, vector<8x32xf32> -> vector<8x32xf32>
    %23 = arith.addf %21, %22 : vector<8x32xf32>
    %24 = math.tanh %23 : vector<8x32xf32>
    %25 = vector.extract_strided_slice %7 {offsets = [32, 0], sizes = [8, 32], strides = [1, 1]} : vector<64x32xf32> to vector<8x32xf32>
    %cst_12 = arith.constant dense<0.000000e+00> : vector<8x32xf32>
    %26 = tpu.matmul %24, %0, %cst_12 {dimension_numbers = #tpu.dot_dimension_numbers<[1], [0], [0], [1], [0, 0, 1, 1], [], []>} : vector<8x32xf32>, vector<32x32xf32>, vector<8x32xf32> -> vector<8x32xf32>
    %27 = arith.addf %25, %26 : vector<8x32xf32>
    %28 = math.tanh %27 : vector<8x32xf32>
    %29 = vector.extract_strided_slice %7 {offsets = [40, 0], sizes = [8, 32], strides = [1, 1]} : vector<64x32xf32> to vector<8x32xf32>
    %cst_13 = arith.constant dense<0.000000e+00> : vector<8x32xf32>
    %30 = tpu.matmul %28, %0, %cst_13 {dimension_numbers = #tpu.dot_dimension_numbers<[1], [0], [0], [1], [0, 0, 1, 1], [], []>} : vector<8x32xf32>, vector<32x32xf32>, vector<8x32xf32> -> vector<8x32xf32>
    %31 = arith.addf %29, %30 : vector<8x32xf32>
    %32 = math.tanh %31 : vector<8x32xf32>
    %33 = vector.extract_strided_slice %7 {offsets = [48, 0], sizes = [8, 32], strides = [1, 1]} : vector<64x32xf32> to vector<8x32xf32>
    %cst_14 = arith.constant dense<0.000000e+00> : vector<8x32xf32>
    %34 = tpu.matmul %32, %0, %cst_14 {dimension_numbers = #tpu.dot_dimension_numbers<[1], [0], [0], [1], [0, 0, 1, 1], [], []>} : vector<8x32xf32>, vector<32x32xf32>, vector<8x32xf32> -> vector<8x32xf32>
    %35 = arith.addf %33, %34 : vector<8x32xf32>
    %36 = math.tanh %35 : vector<8x32xf32>
    %37 = vector.extract_strided_slice %7 {offsets = [56, 0], sizes = [8, 32], strides = [1, 1]} : vector<64x32xf32> to vector<8x32xf32>
    %cst_15 = arith.constant dense<0.000000e+00> : vector<8x32xf32>
    %38 = tpu.matmul %36, %0, %cst_15 {dimension_numbers = #tpu.dot_dimension_numbers<[1], [0], [0], [1], [0, 0, 1, 1], [], []>} : vector<8x32xf32>, vector<32x32xf32>, vector<8x32xf32> -> vector<8x32xf32>
    %39 = arith.addf %37, %38 : vector<8x32xf32>
    %40 = math.tanh %39 : vector<8x32xf32>
    %c0_16 = arith.constant 0 : index
    %c0_17 = arith.constant 0 : index
    %41 = vector.load %arg4[%c0_16, %c0_17] : memref<32x8xf32, #tpu.memory_space<vmem>>, vector<32x8xf32>
    %cst_18 = arith.constant dense<0.000000e+00> : vector<8x8xf32>
    %42 = tpu.matmul %40, %41, %cst_18 {dimension_numbers = #tpu.dot_dimension_numbers<[1], [0], [0], [1], [0, 0, 1, 1], [], []>} : vector<8x32xf32>, vector<32x8xf32>, vector<8x8xf32> -> vector<8x8xf32>
    %c0_19 = arith.constant 0 : index
    %c0_20 = arith.constant 0 : index
    %43 = vector.load %arg5[%c0_19, %c0_20] : memref<1x8xf32, #tpu.memory_space<vmem>>, vector<1x8xf32>
    %44 = vector.broadcast %43 : vector<1x8xf32> to vector<8x8xf32>
    %45 = arith.addf %42, %44 : vector<8x8xf32>
    %c0_21 = arith.constant 0 : index
    %c0_22 = arith.constant 0 : index
    %46 = vector.load %arg6[%c0_21, %c0_22] : memref<8x8xf32, #tpu.memory_space<vmem>>, vector<8x8xf32>
    tpu.vector_store %arg6[%c0_21, %c0_22], %45 {strides = array<i32>} : memref<8x8xf32, #tpu.memory_space<vmem>>, vector<8x8xf32>,
    return
  }
}

</mosaic_0001>

<bundles_post_ra>
// kernel: tpu_custom_call.1
= control target key start
LH: loop header
LB: loop body
LE: loop exit
PB: predicated region body
PF: predicated region fallthrough
CT: control target
= control target key end

     0   :  { %vm44_vm0 = vcmask 64512   ;;  %v1157_v3 = vmov 0.0|0.0   ;;  %s1349_s0 = inlined_call_operand.vmem [shape: f32[64,8], index: 0, kind: input, shape index: {}]   ;;  %s1350_s1 = inlined_call_operand.vmem [shape: f32[8,32], index: 1, kind: input, shape index: {}]   ;;  %s1351_s2 = inlined_call_operand.vmem [shape: f32[32,32], index: 2, kind: input, shape index: {}]   ;;  %s1352_s3 = inlined_call_operand.vmem [shape: f32[1,32], index: 3, kind: input, shape index: {}]   ;;  %s1353_s4 = inlined_call_operand.vmem [shape: f32[32,8], index: 4, kind: input, shape index: {}]   ;;  %s1354_s5 = inlined_call_operand.vmem [shape: f32[1,8], index: 5, kind: input, shape index: {}]   ;;  %s1355_s6 = inlined_call_operand.hbm [shape: f32[8,8], index: 6, kind: output, shape index: {}]  }
   0x1   :  { %v24_v0 = vld [vmem:[%s1351_s2] sm:$0xff]  ;;  %v25_v1 = vld [vmem:[%s1351_s2 + $0x8] sm:$0xff]  ;;  %1059 = vmatprep.subr.bf16.mxu1 %v1157_v3  ;;  %v26_v7 = vld [vmem:[%s1351_s2 + $0x10] sm:$0xff] }
   0x2   :  { %v43_v2 = vld [vmem:[%s1350_s1] sm:$0xff]  ;;  %v1206_v4 = vpack.c.bf16 %v25_v1, %v24_v0  ;;  %v36_v6 = vld [vmem:[%s1349_s0 + $0x8] sm:$0xff]  ;;  %v27_v8 = vld [vmem:[%s1351_s2 + $0x18] sm:$0xff] }
   0x3   :  { %946 = vmatprep.subr.mxu0 %v43_v2  ;;  %v35_v5 = vld [vmem:[%s1349_s0] sm:$0xff] }
   0x4   :  { %947 = vmatpush3.msra.mxu0 %v43_v2  ;;  %948 = vmatprep.mubr.msk.f32.mxu0 %vm44_vm0, %v35_v5 }
   0x5   :  { %11 = vsyncpa [#allocation3], 0  ;;  %1061 = vmatpush3.bf16.msra.mxu1 %v1206_v4  ;;  %949 = vmatmul.mubr.msk.f32.vlgmr.msra.gmra.mrb[0].mxu0 %vm44_vm0, %v36_v6  ;;  %v1223_v9 = vpack.c.bf16 %v27_v8, %v26_v7  ;;  %vm1158_vm1 = vmmov 0   ;;  %v1159_v10 = vmov 0.0   ;;  %v37_v11 = vld [vmem:[%s1349_s0 + $0x10] sm:$0xff]  ;;  %vm174_vm2 = vcmask 261120  }
   0x6   :  { %1062 = vmatprep.subr.bf16.mxu1 %v1157_v3  ;;  %968 = vmatprep.mubr.msk.f32.mxu1 %vm1158_vm1, %v1159_v10  ;;  %v1249_v13 = vld [vmem:[%s1352_s3] ss:$0 sm:$0xff]  ;;  %v38_v20 = vld [vmem:[%s1349_s0 + $0x18] sm:$0xff]  ;;  %v40_v22 = vld [vmem:[%s1349_s0 + $0x28] sm:$0xff]  ;;  %s1160_s7 = smov [#allocation2]  }
   0x7   :  { %1071 = vmatprep.subr.bf16.mxu0 %v1157_v3  ;;  %951 = vmatprep.mubr.msk.f32.mxu0 %vm44_vm0, %v37_v11  ;;  %v39_v21 = vld [vmem:[%s1349_s0 + $0x20] sm:$0xff]  ;;  %v41_v23 = vld [vmem:[%s1349_s0 + $0x30] sm:$0xff]  ;;  %v42_v24 = vld [vmem:[%s1349_s0 + $0x38] sm:$0xff] }
   0x8   :  { %1073 = vmatpush3.bf16.msra.mxu0 %v1206_v4  ;;  %v775_v61 = vld [vmem:[%s1353_s4] sm:$0xff]  ;;  %v776_v62 = vld [vmem:[%s1353_s4 + $0x8] sm:$0xff]  ;;  %v777_v63 = vld [vmem:[%s1353_s4 + $0x10] sm:$0xff] }
   0x9   :  { %1064 = vmatpush3.bf16.msra.mxu1 %v1223_v9  ;;  %1074 = vmatprep.subr.bf16.mxu0 %v1157_v3  ;;  %v1108_v0 = vpack.c.bf16 %v776_v62, %v775_v61  ;;  %v778_v1 = vld [vmem:[%s1353_s4 + $0x18] sm:$0xff]  ;;  %s866_s4 = sshll.u32 %s1160_s7, 4  ;;  %s867_s4 = int_to_ptr.vmem [resolvable:$true] %s866_s4 }
   0xa   :  { %1065 = vmatprep.subr.bf16.mxu1 %v1157_v3  ;;  %952 = vmatmul.mubr.msk.f32.gmra.mrb[2].mxu0 %vm44_vm0, %v38_v20  ;;  %v1111_v2 = vpack.c.bf16 %v778_v1, %v777_v63  ;;  %s1133_s8 = scalar_lea.vmem %s867_s4, 128  ;;  %p1138_p1 = scmp.lt.s32.totalorder %s867_s4, %s867_s4 }
   0xb   :  { %954 = vmatprep.mubr.msk.f32.mxu0 %vm44_vm0, %v39_v21  ;;  %p1134_p0 = scmp.ne.s32.totalorder %s867_s4, %s1133_s8  ;;  %p1139_p2 = scmp.lt.s32.totalorder %s1133_s8, %s1133_s8 }
   0xc   :  { %969 = vmatmul.mubr.f32.vlgmr.msra.gmra.mrb[0].mxu1 %v1159_v10  ;;  %1076 = vmatpush3.bf16.msra.mxu0 %v1223_v9 }
   0xd   :  { %1067 = vmatpush3.bf16.msra.mxu1 %v1206_v4  ;;  %979 = vmatprep.mubr.msk.f32.mxu1 %vm1158_vm1, %v1159_v10  ;;  %p1140_p3 = por %p1139_p2, %p1138_p1 }
   0xe   :  { %1068 = vmatprep.subr.bf16.mxu1 %v1157_v3  ;;  %1083 = vmatprep.subr.bf16.mxu0 %v1157_v3 }
   0xf   :  { %955 = vmatmul.mubr.msk.f32.gmra.mrb[4].mxu0 %vm44_vm0, %v40_v22  ;;  %p1141_p4 = pnand %p1140_p3, %p1134_p0 }
  0x10   :  { %957 = vmatprep.mubr.msk.f32.mxu0 %vm44_vm0, %v41_v23 }
  0x11   :  { %1070 = vmatpush3.bf16.msra.mxu1 %v1223_v9 }
  0x12   :  { %1077 = vmatprep.subr.bf16.mxu1 %v1157_v3 }
  0x13   :  { %958 = vmatmul.mubr.msk.f32.gmra.mrb[6].mxu0 %vm44_vm0, %v42_v24 }
  0x14   :  { %990 = vmatprep.mubr.msk.f32.mxu0 %vm1158_vm1, %v1159_v10 }
  0xd8   :  { %v950_v12 = vpop.f32.mrb[0].mxu0 }
  0xd9   :  { %v135_v14 = vpop.f32.mrb[1].mxu0  ;;  %v141_v25 = vadd.f32 %v950_v12, %v1249_v13 }
  0xda   :  { %v136_v15 = vadd.f32 %v1249_v13, %v135_v14 }
  0xdd   :  { %v953_v30 = vpop.f32.mrb[2].mxu0 }
  0xde   :  { %v145_v31 = vpop.f32.mrb[3].mxu0  ;;  %v151_v41 = vadd.f32 %v953_v30, %v1249_v13 }
  0xdf   :  { %v244_v16 = vpop.f32.mrb[0].mxu1  ;;  %v146_v36 = vadd.f32 %v1249_v13, %v145_v31 }
  0xe0   :  { %v248_v17 = vadd.f32 %v244_v16, %v136_v15  ;;  %v970_v18 = vpop.f32.mrb[1].mxu1 }
  0xe2   :  { %1117 = vtanh.f32 %v248_v17  ;;  %v956_v32 = vpop.f32.mrb[4].mxu0 }
  0xe3   :  { %v155_v33 = vpop.f32.mrb[5].mxu0  ;;  %v161_v51 = vadd.f32 %v956_v32, %v1249_v13 }
  0xe4   :  { %v156_v46 = vadd.f32 %v1249_v13, %v155_v33 }
  0xe6   :  { %v959_v34 = vpop.f32.mrb[6].mxu0 }
  0xe7   :  { %v165_v35 = vpop.f32.mrb[7].mxu0 }
  0xe8   :  { %v166_v56 = vadd.f32 %v1249_v13, %v165_v35 }
  0xec   :  { %v1118_v19 = vpop.eup %1117 }
  0xed   :  { %980 = vmatmul.mubr.msk.f32.vlgmr.msra.gmra.mrb[2].mxu1 %vm174_vm2, %v1118_v19 }
  0xee   :  { %1079 = vmatpush3.bf16.msra.mxu1 %v1206_v4  ;;  %1001 = vmatprep.mubr.msk.f32.mxu1 %vm1158_vm1, %v1159_v10 }
  0xef   :  { %1080 = vmatprep.subr.bf16.mxu1 %v1157_v3 }
  0xf2   :  { %1082 = vmatpush3.bf16.msra.mxu1 %v1223_v9 }
  0xf3   :  { %1089 = vmatprep.subr.bf16.mxu1 %v1157_v3 }
 0x1c0   :  { %v319_v26 = vpop.f32.mrb[2].mxu1 }
 0x1c1   :  { %v323_v27 = vadd.f32 %v319_v26, %v141_v25  ;;  %v981_v28 = vpop.f32.mrb[3].mxu1 }
 0x1c3   :  { %1119 = vtanh.f32 %v323_v27 }
 0x1cd   :  { %v1120_v29 = vpop.eup %1119 }
 0x1ce   :  { %991 = vmatmul.mubr.msk.f32.vlgmr.msra.gmra.mrb[8].mxu0 %vm174_vm2, %v1120_v29 }
 0x1cf   :  { %1085 = vmatpush3.bf16.msra.mxu0 %v1206_v4  ;;  %1012 = vmatprep.mubr.msk.f32.mxu0 %vm1158_vm1, %v1159_v10 }
 0x1d0   :  { %1086 = vmatprep.subr.bf16.mxu0 %v1157_v3 }
 0x1d3   :  { %1088 = vmatpush3.bf16.msra.mxu0 %v1223_v9 }
 0x1d4   :  { %1095 = vmatprep.subr.bf16.mxu0 %v1157_v3 }
 0x2a1   :  { %v394_v37 = vpop.f32.mrb[8].mxu0 }
 0x2a2   :  { %v398_v38 = vadd.f32 %v394_v37, %v146_v36  ;;  %v992_v39 = vpop.f32.mrb[9].mxu0 }
 0x2a4   :  { %1121 = vtanh.f32 %v398_v38 }
 0x2ae   :  { %v1122_v40 = vpop.eup %1121 }
 0x2af   :  { %1002 = vmatmul.mubr.msk.f32.vlgmr.msra.gmra.mrb[4].mxu1 %vm174_vm2, %v1122_v40 }
 0x2b0   :  { %1091 = vmatpush3.bf16.msra.mxu1 %v1206_v4  ;;  %1023 = vmatprep.mubr.msk.f32.mxu1 %vm1158_vm1, %v1159_v10 }
 0x2b1   :  { %1092 = vmatprep.subr.bf16.mxu1 %v1157_v3 }
 0x2b4   :  { %1094 = vmatpush3.bf16.msra.mxu1 %v1223_v9 }
 0x2b5   :  { %1101 = vmatprep.subr.bf16.mxu1 %v1157_v3 }
 0x382   :  { %v469_v42 = vpop.f32.mrb[4].mxu1 }
 0x383   :  { %v473_v43 = vadd.f32 %v469_v42, %v151_v41  ;;  %v1003_v44 = vpop.f32.mrb[5].mxu1 }
 0x385   :  { %1123 = vtanh.f32 %v473_v43 }
 0x38f   :  { %v1124_v45 = vpop.eup %1123 }
 0x390   :  { %1013 = vmatmul.mubr.msk.f32.vlgmr.msra.gmra.mrb[10].mxu0 %vm174_vm2, %v1124_v45 }
 0x391   :  { %1097 = vmatpush3.bf16.msra.mxu0 %v1206_v4  ;;  %1034 = vmatprep.mubr.msk.f32.mxu0 %vm1158_vm1, %v1159_v10 }
 0x392   :  { %1098 = vmatprep.subr.bf16.mxu0 %v1157_v3 }
 0x395   :  { %1100 = vmatpush3.bf16.msra.mxu0 %v1223_v9 }
 0x396   :  { %1107 = vmatprep.subr.bf16.mxu0 %v1157_v3 }
 0x463   :  { %v544_v47 = vpop.f32.mrb[10].mxu0 }
 0x464   :  { %v548_v48 = vadd.f32 %v544_v47, %v156_v46  ;;  %v1014_v49 = vpop.f32.mrb[11].mxu0 }
 0x466   :  { %1125 = vtanh.f32 %v548_v48 }
 0x470   :  { %v1126_v50 = vpop.eup %1125 }
 0x471   :  { %1024 = vmatmul.mubr.msk.f32.vlgmr.msra.gmra.mrb[6].mxu1 %vm174_vm2, %v1126_v50 }
 0x472   :  { %1103 = vmatpush3.bf16.msra.mxu1 %v1206_v4  ;;  %1045 = vmatprep.mubr.msk.f32.mxu1 %vm1158_vm1, %v1159_v10  ;;  %v171_v4 = vadd.f32 %v959_v34, %v1249_v13 }
 0x473   :  { %1104 = vmatprep.subr.bf16.mxu1 %v1157_v3 }
 0x476   :  { %1106 = vmatpush3.bf16.msra.mxu1 %v1223_v9  ;;  %v890_v9 = vld [vmem:[%s1354_s5] ss:$0 sm:$0xff] }
 0x544   :  { %v619_v52 = vpop.f32.mrb[6].mxu1 }
 0x545   :  { %v623_v53 = vadd.f32 %v619_v52, %v161_v51  ;;  %v1025_v54 = vpop.f32.mrb[7].mxu1 }
 0x547   :  { %1127 = vtanh.f32 %v623_v53 }
 0x551   :  { %v1128_v55 = vpop.eup %1127 }
 0x552   :  { %1035 = vmatmul.mubr.msk.f32.vlgmr.msra.gmra.mrb[12].mxu0 %vm174_vm2, %v1128_v55 }
 0x553   :  { %1056 = vmatprep.mubr.msk.f32.mxu0 %vm1158_vm1, %v1159_v10  ;;  %1109 = vmatpush3.bf16.msra.mxu0 %v1108_v0 }
 0x554   :  { %1110 = vmatprep.subr.bf16.mxu0 %v1157_v3 }
 0x557   :  { %1112 = vmatpush3.bf16.msra.mxu0 %v1111_v2 }
 0x625   :  { %v694_v57 = vpop.f32.mrb[12].mxu0 }
 0x626   :  { %v698_v58 = vadd.f32 %v694_v57, %v166_v56  ;;  %v1036_v59 = vpop.f32.mrb[13].mxu0 }
 0x628   :  { %1129 = vtanh.f32 %v698_v58 }
 0x632   :  { %v1130_v60 = vpop.eup %1129 }
 0x633   :  { %1046 = vmatmul.mubr.msk.f32.vlgmr.msra.gmra.mrb[8].mxu1 %vm174_vm2, %v1130_v60 }
 0x706   :  { %v769_v5 = vpop.f32.mrb[8].mxu1 }
 0x707   :  { %v773_v6 = vadd.f32 %v769_v5, %v171_v4  ;;  %v1047_v7 = vpop.f32.mrb[9].mxu1 }
 0x709   :  { %1131 = vtanh.f32 %v773_v6 }
 0x713   :  { %v1132_v8 = vpop.eup %1131 }
 0x714   :  { %1057 = vmatmul.mubr.msk.f32.vlgmr.msra.gmra.mrb[14].mxu0 %vm174_vm2, %v1132_v8 }
 0x7e7   :  { %v855_v10 = vpop.f32.mrb[14].mxu0 }
 0x7e8   :  { %v856_v11 = vadd.f32 %v890_v9, %v855_v10  ;;  %v1058_v12 = vpop.f32.mrb[15].mxu0 }
 0x7ea   :  { %859 = vst.msk [vmem:[#allocation2] sm:$0xff] %vm44_vm0, %v856_v11 }
 0x7eb   :  { %1144 = shalt.err (!%p1141_p4)
}
 0x7ec   :  { %s1145_s2 = scalar_lea.hbm %s1355_s6, 128 }
 0x7ed   :  { %p1146_p5 = scmp.ne.s32.totalorder %s1355_s6, %s1145_s2  ;;  %p1149_p6 = scmp.lt.u32.totalorder %s1145_s2, %s1355_s6 }
 0x7ef   :  { %p1151_p7 = pnand %p1149_p6, %p1146_p5 }
 0x7f1   :  { %1154 = shalt.err (!%p1151_p7)
}
 0x7f2   :  { %869 = dma.vmem_to_hbm [thread:$0]  %s867_s4, 128, %s1355_s6, [#allocation3]  }
 0x7f3   :  { %1155 = dma.done.wait [#allocation3], 128  }
 0x7f4   :  { %1156 = vsyncadd [#allocation3], 4294967168 }
 0x7f5   :  { %873 = vsyncpa [#allocation3], 1 }

</bundles_post_ra>
